<compile_context>
chip_gen: v7x
topology: tpu7x:2x2x1
jax: 0.10.0
libtpu: 0.0.40
codegen_flags: <defaults>
</compile_context>

<pallas_src>
import functools

import jax
import jax.numpy as jnp
from jax import lax
from jax.experimental import pallas as pl
from jax.experimental.pallas import tpu as pltpu

_LANES = 128


def _cdiv(a, b):
    return -(-a // b)


def _num_tensorcores():
    """Best-effort TensorCore count per device (dual-TC / megacore chips)."""
    try:
        kind = jax.devices()[0].device_kind.lower()
    except Exception:
        return 1
    if any(tag in kind for tag in ("v4", "v5p", "v7", "tpu7")):
        return 2
    return 1


def _pick_acc_rows(tile_rows):
    """Widest accumulator slab (<=64 rows) that splits tile_rows cleanly."""
    for d in (64, 32, 16, 8):
        if tile_rows % d == 0:
            return d
    # Small single-block case where tile_rows == rows and rows % 8 != 0:
    # use the full (rows,128) slab (trivial reshape, tiny arrays only).
    return tile_rows


def _ensemble_sums_kernel(pred_ref, tgt_ref, l1_ref, sq_ref, acc_l1, acc_sq,
                          *, tile_rows, acc_rows, total_rows, mask_possible):
    j = pl.program_id(1)  # reduction axis (per parallel slice)

    @pl.when(j == 0)
    def _():
        acc_l1[...] = jnp.zeros_like(acc_l1)
        acc_sq[...] = jnp.zeros_like(acc_sq)

    n_chunks = tile_rows // acc_rows
    aligned = (acc_rows % 8) == 0

    def accumulate(masked, row_start):
        def body(c, carry):
            a_l1, a_sq = carry
            r0 = c * acc_rows
            if aligned:
                r0 = pl.multiple_of(r0, 8)
            # Per-chunk loads + f32 upcast; everything stays in vregs.
            p = pred_ref[pl.ds(r0, acc_rows), :].astype(jnp.float32)
            t = tgt_ref[pl.ds(r0, acc_rows), :].astype(jnp.float32)
            d = p - t
            if masked:
                row = lax.broadcasted_iota(jnp.int32, (acc_rows, 1), 0)
                keep = (row_start + r0 + row) < total_rows
                d = jnp.where(keep, d, 0.0)   # select: garbage rows -> 0
            return (a_l1 + jnp.abs(d), a_sq + d * d)

        a_l1, a_sq = lax.fori_loop(0, n_chunks, body,
                                   (acc_l1[...], acc_sq[...]),
                                   unroll=min(2, n_chunks))
        acc_l1[...] = a_l1
        acc_sq[...] = a_sq

    if mask_possible:
        blk = pl.program_id(0) * pl.num_programs(1) + j   # unclamped block id
        row_start = blk * tile_rows
        needs_mask = row_start + tile_rows > total_rows

        @pl.when(needs_mask)
        def _():
            accumulate(True, row_start)

        @pl.when(jnp.logical_not(needs_mask))
        def _():
            accumulate(False, row_start)
    else:
        accumulate(False, 0)

    @pl.when(j == pl.num_programs(1) - 1)
    def _():
        l1_ref[...] = acc_l1[...][None]
        sq_ref[...] = acc_sq[...][None]


def ensemble_loss(pred, target, *, l1_weight=0.7, mse_weight=0.3,
                  max_tile_rows=4096):
    """loss = l1_weight * mean(|pred - target|) + mse_weight * mean((pred - target)^2)

    Single fused streaming pass over pred/target in Pallas.
    """
    assert pred.shape == target.shape, (pred.shape, target.shape)
    n = int(pred.size)
    assert n > 0

    p_flat = pred.reshape(-1)     # free reshape (bitcast)
    t_flat = target.reshape(-1)

    rows = n // _LANES
    n_main = rows * _LANES
    rem = n - n_main

    # Sub-128-element ragged tail: plain jnp, negligible work.
    tail_l1 = jnp.float32(0.0)
    tail_sq = jnp.float32(0.0)
    if rem:
        dt = (p_flat[n_main:].astype(jnp.float32)
              - t_flat[n_main:].astype(jnp.float32))
        tail_l1 = jnp.sum(jnp.abs(dt))
        tail_sq = jnp.sum(dt * dt)

    if rows == 0:
        l1_sum, sq_sum = tail_l1, tail_sq
    else:
        if rem:
            # TODO(synk): a fully copy-free ragged path needs a manual-DMA
            # (memory_space=pl.ANY) kernel; this prefix slice is the only
            # remaining HBM copy and only triggers when n % 128 != 0.
            p2 = p_flat[:n_main].reshape(rows, _LANES)
            t2 = t_flat[:n_main].reshape(rows, _LANES)
        else:
            p2 = p_flat.reshape(rows, _LANES)   # free reshape, no copy
            t2 = t_flat.reshape(rows, _LANES)

        # tile_rows never exceeds the array: when rows < max_tile_rows the
        # single block equals the full dim (always legal); otherwise it is
        # 4096 (a multiple of the 8/16/32-row f32/bf16/int8 sublane packing).
        tile_rows = min(rows, max_tile_rows)
        acc_rows = _pick_acc_rows(tile_rows)
        blocks = _cdiv(rows, tile_rows)

        num_parallel = 2 if (blocks >= 2 and _num_tensorcores() >= 2) else 1
        steps = _cdiv(blocks, num_parallel)
        mask_possible = num_parallel * steps * tile_rows > rows

        if num_parallel * steps > blocks:
            # Phantom programs exist (odd block count on a dual-TC split):
            # clamp the DMA to the last real block; the kernel masks it out.
            def in_map(i, j):
                return (jnp.minimum(i * steps + j, blocks - 1), 0)
        else:
            def in_map(i, j):
                return (i * steps + j, 0)

        kernel = functools.partial(
            _ensemble_sums_kernel,
            tile_rows=tile_rows,
            acc_rows=acc_rows,
            total_rows=rows,
            mask_possible=mask_possible,
        )

        itemsize = max(jnp.dtype(pred.dtype).itemsize,
                       jnp.dtype(target.dtype).itemsize)
        out_bytes = 2 * num_parallel * acc_rows * _LANES * 4
        cost = pl.CostEstimate(
            flops=5 * n_main,
            transcendentals=0,
            bytes_accessed=2 * n_main * itemsize + out_bytes,
        )

        part_l1, part_sq = pl.pallas_call(
            kernel,
            out_shape=(
                jax.ShapeDtypeStruct((num_parallel, acc_rows, _LANES),
                                     jnp.float32),
                jax.ShapeDtypeStruct((num_parallel, acc_rows, _LANES),
                                     jnp.float32),
            ),
            grid_spec=pltpu.PrefetchScalarGridSpec(
                num_scalar_prefetch=0,
                grid=(num_parallel, steps),
                in_specs=[
                    pl.BlockSpec((tile_rows, _LANES), in_map),
                    pl.BlockSpec((tile_rows, _LANES), in_map),
                ],
                out_specs=(
                    pl.BlockSpec((1, acc_rows, _LANES), lambda i, j: (i, 0, 0)),
                    pl.BlockSpec((1, acc_rows, _LANES), lambda i, j: (i, 0, 0)),
                ),
                scratch_shapes=[
                    pltpu.VMEM((acc_rows, _LANES), jnp.float32),  # L1 acc
                    pltpu.VMEM((acc_rows, _LANES), jnp.float32),  # MSE acc
                ],
            ),
            compiler_params=pltpu.CompilerParams(
                dimension_semantics=("parallel", "arbitrary"),
            ),
            cost_estimate=cost,
        )(p2, t2)

        # Tiny final reduce of the (num_parallel, acc_rows, 128) partials.
        l1_sum = jnp.sum(part_l1) + tail_l1
        sq_sum = jnp.sum(part_sq) + tail_sq

    inv_n = jnp.float32(1.0 / float(n))
    return (jnp.float32(l1_weight) * l1_sum
            + jnp.float32(mse_weight) * sq_sum) * inv_n


def ensemble_loss_ref(pred, target, *, l1_weight=0.7, mse_weight=0.3):
    d = pred.astype(jnp.float32) - target.astype(jnp.float32)
    return l1_weight * jnp.mean(jnp.abs(d)) + mse_weight * jnp.mean(d * d)


if __name__ == "__main__":
    key = jax.random.PRNGKey(0)

    # Primary case: small NCHW inputs consistent with the module.
    k1, k2 = jax.random.split(key)
    pred = jax.random.normal(k1, (2, 4, 16, 16), dtype=jnp.float32)
    target = jax.random.normal(k2, (2, 4, 16, 16), dtype=jnp.float32)
    out = jax.block_until_ready(ensemble_loss(pred, target))
    ref = ensemble_loss_ref(pred, target)
    assert jnp.allclose(out, ref, rtol=1e-5, atol=1e-6), (out, ref)

    # Ragged shape (n % 128 != 0): exercises the jnp tail + full-dim block.
    k3, k4 = jax.random.split(k1)
    pred_r = jax.random.normal(k3, (2, 3, 15, 17), dtype=jnp.float32)
    target_r = jax.random.normal(k4, (2, 3, 15, 17), dtype=jnp.float32)
    out_r = jax.block_until_ready(ensemble_loss(pred_r, target_r))
    ref_r = ensemble_loss_ref(pred_r, target_r)
    assert jnp.allclose(out_r, ref_r, rtol=1e-5, atol=1e-6), (out_r, ref_r)

    # Larger bf16 shape: single 4096-row block, chunked fori accumulation,
    # half-bandwidth input path.
    k5, k6 = jax.random.split(k2)
    pred_b = jax.random.normal(k5, (8, 16, 64, 64), dtype=jnp.float32)
    target_b = jax.random.normal(k6, (8, 16, 64, 64), dtype=jnp.float32)
    out_b = jax.block_until_ready(
        ensemble_loss(pred_b.astype(jnp.bfloat16), target_b.astype(jnp.bfloat16)))
    ref_b = ensemble_loss_ref(pred_b.astype(jnp.bfloat16),
                              target_b.astype(jnp.bfloat16))
    assert jnp.allclose(out_b, ref_b, rtol=1e-3, atol=1e-5), (out_b, ref_b)

    # Multi-block + partial last block (exercises the in-kernel mask path,
    # no wrapper padding): rows = 4608, tile_rows = 1024 -> 5 blocks, last
    # block has only 512 valid rows.
    k7, k8 = jax.random.split(k5)
    pred_m = jax.random.normal(k7, (9, 16, 64, 64), dtype=jnp.float32)
    target_m = jax.random.normal(k8, (9, 16, 64, 64), dtype=jnp.float32)
    out_m = jax.block_until_ready(
        ensemble_loss(pred_m, target_m, max_tile_rows=1024))
    ref_m = ensemble_loss_ref(pred_m, target_m)
    assert jnp.allclose(out_m, ref_m, rtol=1e-5, atol=1e-6), (out_m, ref_m)

    print("KERNEL_OK")
</pallas_src>

<mosaic_0001>
module attributes {stable_mosaic.version = 11 : i64} {
  func.func @_ensemble_sums_kernel(%arg0: i32, %arg1: i32, %arg2: memref<16x128xf32, #tpu.memory_space<vmem>>, %arg3: memref<16x128xf32, #tpu.memory_space<vmem>>, %arg4: memref<1x16x128xf32, #tpu.memory_space<vmem>>, %arg5: memref<1x16x128xf32, #tpu.memory_space<vmem>>, %arg6: memref<16x128xf32, #tpu.memory_space<vmem>>, %arg7: memref<16x128xf32, #tpu.memory_space<vmem>>) attributes {dimension_semantics = [#tpu.dimension_semantics<parallel>, #tpu.dimension_semantics<arbitrary>], iteration_bounds = array<i64: 1, 1>, scalar_prefetch = 0 : i64, scratch_operands = 2 : i64, tpu.core_type = #tpu.core_type<tc>, window_params = [{transform_indices = @transform_0, window_bounds = array<i64: 16, 128>}, {transform_indices = @transform_1, window_bounds = array<i64: 16, 128>}, {transform_indices = @transform_2, window_bounds = array<i64: 1, 16, 128>}, {transform_indices = @transform_3, window_bounds = array<i64: 1, 16, 128>}]} {
    %c0_i32 = arith.constant 0 : i32
    %0 = arith.cmpi eq, %arg1, %c0_i32 : i32
    %1 = arith.extui %0 : i1 to i32
    %c0_i32_0 = arith.constant 0 : i32
    %2 = arith.cmpi ne, %1, %c0_i32_0 : i32
    scf.if %2 {
      %cst = arith.constant 0.000000e+00 : f32
      %21 = vector.broadcast %cst : f32 to vector<16x128xf32>
      %c0_13 = arith.constant 0 : index
      %c0_14 = arith.constant 0 : index
      %22 = vector.load %arg6[%c0_13, %c0_14] : memref<16x128xf32, #tpu.memory_space<vmem>>, vector<16x128xf32>
      tpu.vector_store %arg6[%c0_13, %c0_14], %21 {strides = array<i32>} : memref<16x128xf32, #tpu.memory_space<vmem>>, vector<16x128xf32>,
      %cst_15 = arith.constant 0.000000e+00 : f32
      %23 = vector.broadcast %cst_15 : f32 to vector<16x128xf32>
      %c0_16 = arith.constant 0 : index
      %c0_17 = arith.constant 0 : index
      %24 = vector.load %arg7[%c0_16, %c0_17] : memref<16x128xf32, #tpu.memory_space<vmem>>, vector<16x128xf32>
      tpu.vector_store %arg7[%c0_16, %c0_17], %23 {strides = array<i32>} : memref<16x128xf32, #tpu.memory_space<vmem>>, vector<16x128xf32>,
    } else {
    }
    %c0 = arith.constant 0 : index
    %c0_1 = arith.constant 0 : index
    %3 = vector.load %arg6[%c0, %c0_1] : memref<16x128xf32, #tpu.memory_space<vmem>>, vector<16x128xf32>
    %c0_2 = arith.constant 0 : index
    %c0_3 = arith.constant 0 : index
    %4 = vector.load %arg7[%c0_2, %c0_3] : memref<16x128xf32, #tpu.memory_space<vmem>>, vector<16x128xf32>
    %c0_i32_4 = arith.constant 0 : i32
    %c16_i32 = arith.constant 16 : i32
    %5 = arith.muli %c0_i32_4, %c16_i32 : i32
    %6 = tpu.assume_multiple %5, 8 : i32
    %7 = arith.index_cast %6 : i32 to index
    %c0_5 = arith.constant 0 : index
    %8 = vector.load %arg2[%7, %c0_5] : memref<16x128xf32, #tpu.memory_space<vmem>>, vector<16x128xf32>
    %9 = arith.index_cast %6 : i32 to index
    %c0_6 = arith.constant 0 : index
    %10 = vector.load %arg3[%9, %c0_6] : memref<16x128xf32, #tpu.memory_space<vmem>>, vector<16x128xf32>
    %11 = arith.subf %8, %10 : vector<16x128xf32>
    %12 = math.absf %11 : vector<16x128xf32>
    %13 = arith.addf %3, %12 : vector<16x128xf32>
    %14 = arith.mulf %11, %11 : vector<16x128xf32>
    %15 = arith.addf %4, %14 : vector<16x128xf32>
    %c1_i32 = arith.constant 1 : i32
    %c0_7 = arith.constant 0 : index
    %c0_8 = arith.constant 0 : index
    %16 = vector.load %arg6[%c0_7, %c0_8] : memref<16x128xf32, #tpu.memory_space<vmem>>, vector<16x128xf32>
    tpu.vector_store %arg6[%c0_7, %c0_8], %13 {strides = array<i32>} : memref<16x128xf32, #tpu.memory_space<vmem>>, vector<16x128xf32>,
    %c0_9 = arith.constant 0 : index
    %c0_10 = arith.constant 0 : index
    %17 = vector.load %arg7[%c0_9, %c0_10] : memref<16x128xf32, #tpu.memory_space<vmem>>, vector<16x128xf32>
    tpu.vector_store %arg7[%c0_9, %c0_10], %15 {strides = array<i32>} : memref<16x128xf32, #tpu.memory_space<vmem>>, vector<16x128xf32>,
    %c0_i32_11 = arith.constant 0 : i32
    %18 = arith.cmpi eq, %arg1, %c0_i32_11 : i32
    %19 = arith.extui %18 : i1 to i32
    %c0_i32_12 = arith.constant 0 : i32
    %20 = arith.cmpi ne, %19, %c0_i32_12 : i32
    scf.if %20 {
      %c0_13 = arith.constant 0 : index
      %c0_14 = arith.constant 0 : index
      %21 = vector.load %arg6[%c0_13, %c0_14] : memref<16x128xf32, #tpu.memory_space<vmem>>, vector<16x128xf32>
      %22 = vector.shape_cast %21 : vector<16x128xf32> to vector<1x16x128xf32>
      %c0_15 = arith.constant 0 : index
      %c0_16 = arith.constant 0 : index
      %c0_17 = arith.constant 0 : index
      %23 = vector.load %arg4[%c0_15, %c0_16, %c0_17] : memref<1x16x128xf32, #tpu.memory_space<vmem>>, vector<1x16x128xf32>
      tpu.vector_store %arg4[%c0_15, %c0_16, %c0_17], %22 {strides = array<i32>} : memref<1x16x128xf32, #tpu.memory_space<vmem>>, vector<1x16x128xf32>,
      %c0_18 = arith.constant 0 : index
      %c0_19 = arith.constant 0 : index
      %24 = vector.load %arg7[%c0_18, %c0_19] : memref<16x128xf32, #tpu.memory_space<vmem>>, vector<16x128xf32>
      %25 = vector.shape_cast %24 : vector<16x128xf32> to vector<1x16x128xf32>
      %c0_20 = arith.constant 0 : index
      %c0_21 = arith.constant 0 : index
      %c0_22 = arith.constant 0 : index
      %26 = vector.load %arg5[%c0_20, %c0_21, %c0_22] : memref<1x16x128xf32, #tpu.memory_space<vmem>>, vector<1x16x128xf32>
      tpu.vector_store %arg5[%c0_20, %c0_21, %c0_22], %25 {strides = array<i32>} : memref<1x16x128xf32, #tpu.memory_space<vmem>>, vector<1x16x128xf32>,
    } else {
    }
    return
  }
  func.func @transform_0(%arg0: i32, %arg1: i32) -> (i32, i32) {
    %c1_i32 = arith.constant 1 : i32
    %0 = arith.muli %arg0, %c1_i32 : i32
    %1 = arith.addi %0, %arg1 : i32
    %c0_i32 = arith.constant 0 : i32
    %c0_i32_0 = arith.constant 0 : i32
    return %1, %c0_i32 : i32, i32
  }
  func.func @transform_1(%arg0: i32, %arg1: i32) -> (i32, i32) {
    %c1_i32 = arith.constant 1 : i32
    %0 = arith.muli %arg0, %c1_i32 : i32
    %1 = arith.addi %0, %arg1 : i32
    %c0_i32 = arith.constant 0 : i32
    %c0_i32_0 = arith.constant 0 : i32
    return %1, %c0_i32 : i32, i32
  }
  func.func @transform_2(%arg0: i32, %arg1: i32) -> (i32, i32, i32) {
    %c0_i32 = arith.constant 0 : i32
    %c0_i32_0 = arith.constant 0 : i32
    %c0_i32_1 = arith.constant 0 : i32
    return %arg0, %c0_i32, %c0_i32_0 : i32, i32, i32
  }
  func.func @transform_3(%arg0: i32, %arg1: i32) -> (i32, i32, i32) {
    %c0_i32 = arith.constant 0 : i32
    %c0_i32_0 = arith.constant 0 : i32
    %c0_i32_1 = arith.constant 0 : i32
    return %arg0, %c0_i32, %c0_i32_0 : i32, i32, i32
  }
}

</mosaic_0001>

<bundles_post_ra>
// kernel: tpu_custom_call.1
= control target key start
LH: loop header
LB: loop body
LE: loop exit
PB: predicated region body
PF: predicated region fallthrough
CT: control target
= control target key end

     0   :  { %9 = vsyncpa [#allocation5], 0  ;;  %s325_s0 = inlined_call_operand.hbm [shape: f32[16,128], index: 0, kind: input, shape index: {}]   ;;  %s326_s1 = inlined_call_operand.hbm [shape: f32[16,128], index: 1, kind: input, shape index: {}]   ;;  %s327_s2 = inlined_call_operand.hbm [shape: f32[1,16,128], index: 2, kind: output, shape index: {0}]   ;;  %s328_s3 = inlined_call_operand.hbm [shape: f32[1,16,128], index: 3, kind: output, shape index: {1}]  }
   0x1   :  { %10 = vsyncpa [#allocation8], 0 }
   0x2   :  { %11 = vsyncpa [#allocation6], 0 }
   0x3   :  { %12 = vsyncpa [#allocation11], 0  ;;  %s232_s12 = smov [#allocation4]   ;;  %s136_s16 = scalar_lea.hbm %s325_s0, 256 }
   0x4   :  { %s22_s13 = sshll.u32 %s232_s12, 4  ;;  %p137_p0 = scmp.ne.s32.totalorder %s325_s0, %s136_s16  ;;  %s23_s13 = int_to_ptr.vmem [resolvable:$true] %s22_s13 }
   0x5   :  { %p140_p1 = scmp.lt.u32.totalorder %s136_s16, %s325_s0 }
   0x7   :  { %p142_p2 = pnand %p140_p1, %p137_p0 }
   0x9   :  { %145 = shalt.err (!%p142_p2)
}
   0xa   :  { %s146_s21 = scalar_lea.vmem %s23_s13, 256  ;;  %p151_p4 = scmp.lt.s32.totalorder %s23_s13, %s23_s13 }
   0xb   :  { %p147_p3 = scmp.ne.s32.totalorder %s23_s13, %s146_s21  ;;  %p152_p5 = scmp.lt.s32.totalorder %s146_s21, %s146_s21 }
   0xd   :  { %p153_p6 = por %p152_p5, %p151_p4 }
   0xf   :  { %p154_p7 = pnand %p153_p6, %p147_p3 }
  0x11   :  { %157 = shalt.err (!%p154_p7)
}
  0x12   :  { %s233_s22 = smov 128   ;;  %s234_s23 = smov 8  }
  0x13   :  { %28 = dma.hbm_to_vmem [thread:$0]  %s325_s0, 256, %s23_s13, [#allocation5], %s233_s22, %s233_s22, %s234_s23  }
  0x14   :  { %s235_s26 = smov [#allocation7]   ;;  %s158_s30 = scalar_lea.hbm %s326_s1, 256 }
  0x15   :  { %s38_s27 = sshll.u32 %s235_s26, 4  ;;  %p159_p8 = scmp.ne.s32.totalorder %s326_s1, %s158_s30  ;;  %s39_s27 = int_to_ptr.vmem [resolvable:$true] %s38_s27 }
  0x16   :  { %p162_p9 = scmp.lt.u32.totalorder %s158_s30, %s326_s1 }
  0x18   :  { %p164_p10 = pnand %p162_p9, %p159_p8 }
  0x1a   :  { %167 = shalt.err (!%p164_p10)
}
  0x1b   :  { %s168_s8 = scalar_lea.vmem %s39_s27, 256  ;;  %p173_p12 = scmp.lt.s32.totalorder %s39_s27, %s39_s27 }
  0x1c   :  { %p169_p11 = scmp.ne.s32.totalorder %s39_s27, %s168_s8  ;;  %p174_p13 = scmp.lt.s32.totalorder %s168_s8, %s168_s8 }
  0x1e   :  { %p175_p0 = por %p174_p13, %p173_p12 }
  0x20   :  { %p176_p1 = pnand %p175_p0, %p169_p11 }
  0x22   :  { %179 = shalt.err (!%p176_p1)
}
  0x23   :  { %44 = dma.hbm_to_vmem [thread:$0]  %s326_s1, 256, %s39_s27, [#allocation8], %s233_s22, %s233_s22, %s234_s23  }
  0x24   :  { %224 = dma.done.wait [#allocation5], 256  }
  0x25   :  { %225 = vsyncadd [#allocation5], 4294967040 }
  0x26   :  { %226 = dma.done.wait [#allocation8], 256  }
  0x27   :  { %227 = vsyncadd [#allocation8], 4294967040  ;;  %v67_v0 = vld [vmem:[#allocation4] sm:$0xff]  ;;  %v69_v1 = vld [vmem:[#allocation7] sm:$0xff]  ;;  %s236_s10 = smov [#allocation9]   ;;  %s237_s12 = smov [#allocation10]  }
  0x28   :  { %v68_v2 = vld [vmem:[#allocation4 + $0x8] sm:$0xff]  ;;  %v71_v3 = vsub.f32 %v67_v0, %v69_v1  ;;  %v70_v4 = vld [vmem:[#allocation7 + $0x8] sm:$0xff]  ;;  %s101_s11 = sshll.u32 %s236_s10, 4  ;;  %s113_s13 = sshll.u32 %s237_s12, 4  ;;  %s102_s11 = int_to_ptr.vmem [resolvable:$true] %s101_s11  ;;  %s288_s13 = int_to_ptr.vmem [resolvable:$true] %s113_s13 }
  0x29   :  { %v72_v5 = vsub.f32 %v68_v2, %v70_v4  ;;  %s180_s1 = scalar_lea.vmem %s102_s11, 256  ;;  %p185_p3 = scmp.lt.s32.totalorder %s102_s11, %s102_s11 }
  0x2a   :  { %v73_v6 = vand.u32 2147483647, %v71_v3  ;;  %v77_v7 = vmul.f32 %v71_v3, %v71_v3  ;;  %p181_p2 = scmp.ne.s32.totalorder %s102_s11, %s180_s1  ;;  %p186_p4 = scmp.lt.s32.totalorder %s180_s1, %s180_s1 }
  0x2b   :  { %v74_v8 = vand.u32 2147483647, %v72_v5  ;;  %v78_v9 = vmul.f32 %v72_v5, %v72_v5 }
  0x2c   :  { %90 = vst [vmem:[#allocation9] sm:$0xff] %v73_v6  ;;  %94 = vst [vmem:[#allocation10] sm:$0xff] %v77_v7  ;;  %p187_p5 = por %p186_p4, %p185_p3 }
  0x2d   :  { %91 = vst [vmem:[#allocation9 + $0x8] sm:$0xff] %v74_v8  ;;  %95 = vst [vmem:[#allocation10 + $0x8] sm:$0xff] %v78_v9 }
  0x2e   :  { %p188_p6 = pnand %p187_p5, %p181_p2 }
  0x30   :  { %191 = shalt.err (!%p188_p6)
}
  0x31   :  { %s192_s16 = scalar_lea.hbm %s327_s2, 256 }
  0x32   :  { %p193_p7 = scmp.ne.s32.totalorder %s327_s2, %s192_s16  ;;  %p196_p8 = scmp.lt.u32.totalorder %s192_s16, %s327_s2 }
  0x34   :  { %p198_p9 = pnand %p196_p8, %p193_p7 }
  0x36   :  { %201 = shalt.err (!%p198_p9)
}
  0x37   :  { %107 = dma.vmem_to_hbm [thread:$0]  %s102_s11, 256, %s327_s2, [#allocation6], %s233_s22, %s233_s22, %s234_s23  }
  0x38   :  { %s202_s25 = scalar_lea.vmem %s288_s13, 256  ;;  %p207_p11 = scmp.lt.s32.totalorder %s288_s13, %s288_s13 }
  0x39   :  { %p203_p10 = scmp.ne.s32.totalorder %s288_s13, %s202_s25  ;;  %p208_p12 = scmp.lt.s32.totalorder %s202_s25, %s202_s25 }
  0x3b   :  { %p209_p13 = por %p208_p12, %p207_p11 }
  0x3d   :  { %p210_p0 = pnand %p209_p13, %p203_p10 }
  0x3f   :  { %213 = shalt.err (!%p210_p0)
}
  0x40   :  { %s214_s28 = scalar_lea.hbm %s328_s3, 256 }
  0x41   :  { %p215_p1 = scmp.ne.s32.totalorder %s328_s3, %s214_s28  ;;  %p218_p2 = scmp.lt.u32.totalorder %s214_s28, %s328_s3 }
  0x43   :  { %p220_p3 = pnand %p218_p2, %p215_p1 }
  0x45   :  { %223 = shalt.err (!%p220_p3)
}
  0x46   :  { %119 = dma.vmem_to_hbm [thread:$0]  %s288_s13, 256, %s328_s3, [#allocation11], %s233_s22, %s233_s22, %s234_s23  }
  0x47   :  { %228 = dma.done.wait [#allocation6], 256  }
  0x48   :  { %229 = vsyncadd [#allocation6], 4294967040 }
  0x49   :  { %230 = dma.done.wait [#allocation11], 256  }
  0x4a   :  { %231 = vsyncadd [#allocation11], 4294967040 }
  0x4b   :  { %126 = vsyncpa [#allocation5], 1 }
  0x4c   :  { %127 = vsyncpa [#allocation8], 1 }
  0x4d   :  { %128 = vsyncpa [#allocation6], 1 }
  0x4e   :  { %129 = vsyncpa [#allocation11], 1 }

</bundles_post_ra>
